<compile_context>
chip_gen: v6e
topology: v6e:2x2x1
jax: 0.10.0
libtpu: 0.0.40
codegen_flags: <defaults>
</compile_context>

<pallas_src>
import functools
import math

import jax
import jax.numpy as jnp
from jax.experimental import pallas as pl
from jax.experimental.pallas import tpu as pltpu


def _round_up(n, m):
    return ((n + m - 1) // m) * m


def _apply_activation(z, activation):
    if activation == "relu":
        return jnp.maximum(z, 0.0)
    elif activation == "tanh":
        return jnp.tanh(z)
    else:  # sigmoid
        return jax.nn.sigmoid(z)


def _mlp_kernel(activation, num_layers, *refs):
    """refs = (x_ref, w0, b0, ..., w_{L-1}, b_{L-1}, w_out_row, b_out, out_ref).

    x_ref      : (TB, input_size)  streamed batch tile (VMEM)
    w_i        : (in_i, hidden)    VMEM-resident (constant index_map)
    b_i        : (1, hidden)       VMEM-resident
    w_out_row  : (1, hidden)       final Linear(hidden,1) weight, pre-transposed
    b_out      : (1, 1) f32        final bias, SMEM scalar
    out_ref    : (TB, 1)
    Dropout layers are identity (eval()/inference semantics).
    """
    x_ref = refs[0]
    out_ref = refs[-1]
    p = refs[1:-1]

    # Hidden layers: feed the MXU the native dtype, accumulate in f32.
    h = x_ref[...]
    for i in range(num_layers):
        w = p[2 * i][...]
        b = p[2 * i + 1][...]
        z = jnp.dot(h, w, preferred_element_type=jnp.float32)
        z = z + b.astype(jnp.float32)
        a = _apply_activation(z, activation)
        h = a.astype(w.dtype)  # back to native dtype for the next MXU feed

    # Final Linear(hidden, 1) + sigmoid as VPU multiply + lane reduction:
    # avoids burning a full MXU pass for a single output column.
    w_row = p[2 * num_layers][...].astype(jnp.float32)   # (1, hidden)
    b_out = p[2 * num_layers + 1][0, 0]                  # SMEM scalar (f32)
    y = jnp.sum(h.astype(jnp.float32) * w_row, axis=-1, keepdims=True) + b_out
    out_ref[...] = jax.nn.sigmoid(y).astype(out_ref.dtype)


def init_params(key, input_size, num_layers, hidden_units, dtype=jnp.float32):
    """Deterministic PyTorch-style Linear init: U(-1/sqrt(fan_in), 1/sqrt(fan_in))."""
    params = []
    in_features = input_size
    for _ in range(num_layers):
        key, kw, kb = jax.random.split(key, 3)
        bound = 1.0 / math.sqrt(in_features)
        w = jax.random.uniform(kw, (in_features, hidden_units), dtype, -bound, bound)
        b = jax.random.uniform(kb, (1, hidden_units), dtype, -bound, bound)
        params += [w, b]
        in_features = hidden_units
    key, kw, kb = jax.random.split(key, 3)
    bound = 1.0 / math.sqrt(in_features)
    w = jax.random.uniform(kw, (in_features, 1), dtype, -bound, bound)
    b = jax.random.uniform(kb, (1, 1), dtype, -bound, bound)
    params += [w, b]
    return params


def simple_nn_forward(x, params, num_layers, activation="relu", block_batch=256):
    """params = [w0, b0, ..., w_{L-1}, b_{L-1}, w_out, b_out] with w_i (in, out)."""
    batch, input_size = x.shape
    dtype = x.dtype

    # Batch tile: multiple of 8 (f32 sublane); 256 rows fills the v6e/v7x MXU.
    tb = min(block_batch, _round_up(batch, 8))
    padded_batch = _round_up(batch, tb)
    if padded_batch != batch:
        x = jnp.pad(x, ((0, padded_batch - batch), (0, 0)))
    grid = (padded_batch // tb,)

    hidden = params[-2].shape[0]
    # Final layer weight (hidden, 1) -> lane-major row (1, hidden) for the VPU reduce.
    w_out_row = params[-2].reshape(1, hidden)
    # Final bias as an f32 SMEM scalar (SMEM is 32-bit scalar memory).
    b_out = params[-1].reshape(1, 1).astype(jnp.float32)
    kernel_args = list(params[:-2]) + [w_out_row, b_out]

    def const_spec(shape):
        # Same block every grid step -> DMA'd once, stays resident in VMEM.
        return pl.BlockSpec(shape, lambda i: (0, 0))

    in_specs = [pl.BlockSpec((tb, input_size), lambda i: (i, 0))]       # streamed x
    for arr in kernel_args[:-1]:
        in_specs.append(const_spec(arr.shape))                          # resident params
    in_specs.append(pl.BlockSpec(memory_space=pltpu.MemorySpace.SMEM))  # b_out scalar

    kernel = functools.partial(_mlp_kernel, activation, num_layers)
    out = pl.pallas_call(
        kernel,
        out_shape=jax.ShapeDtypeStruct((padded_batch, 1), dtype),
        grid=grid,
        in_specs=in_specs,
        out_specs=pl.BlockSpec((tb, 1), lambda i: (i, 0)),
        compiler_params=pltpu.CompilerParams(
            # Batch tiles are independent -> shard across TCs on v7x (no-op on v5e/v6e).
            dimension_semantics=("parallel",),
        ),
    )(x, *kernel_args)
    return out[:batch]


def _reference(x, params, num_layers, activation="relu"):
    h = x.astype(jnp.float32)
    for i in range(num_layers):
        h = h @ params[2 * i].astype(jnp.float32) + params[2 * i + 1].astype(jnp.float32)
        h = _apply_activation(h, activation)
    y = h @ params[-2].astype(jnp.float32) + params[-1].astype(jnp.float32)
    return jax.nn.sigmoid(y)


if __name__ == "__main__":
    input_size = 16
    num_layers = 2
    hidden_units = 32
    activation = "relu"

    key = jax.random.PRNGKey(0)
    key, kx = jax.random.split(key)
    params = init_params(key, input_size, num_layers, hidden_units)

    # 1) Small batch (single tile).
    batch = 8
    x = jax.random.normal(kx, (batch, input_size), dtype=jnp.float32)
    out = jax.block_until_ready(simple_nn_forward(x, params, num_layers, activation))
    ref = _reference(x, params, num_layers, activation)
    assert out.shape == (batch, 1)
    assert jnp.allclose(out, ref, atol=1e-4, rtol=1e-4), "f32 small-batch mismatch"

    # 2) Larger batch exercising the batch grid (2 tiles) + pad/slice path.
    key, kx2 = jax.random.split(key)
    batch2 = 300
    x2 = jax.random.normal(kx2, (batch2, input_size), dtype=jnp.float32)
    out2 = jax.block_until_ready(simple_nn_forward(x2, params, num_layers, activation))
    ref2 = _reference(x2, params, num_layers, activation)
    assert out2.shape == (batch2, 1)
    assert jnp.allclose(out2, ref2, atol=1e-4, rtol=1e-4), "f32 gridded-batch mismatch"

    # 3) bf16 path: native MXU dtype with f32 accumulation.
    xb = x2.astype(jnp.bfloat16)
    pb = [p.astype(jnp.bfloat16) for p in params]
    outb = jax.block_until_ready(simple_nn_forward(xb, pb, num_layers, activation))
    refb = _reference(xb.astype(jnp.float32),
                      [p.astype(jnp.float32) for p in pb], num_layers, activation)
    assert outb.shape == (batch2, 1)
    assert jnp.all(jnp.isfinite(outb.astype(jnp.float32)))
    assert jnp.allclose(outb.astype(jnp.float32), refb, atol=5e-2, rtol=5e-2), "bf16 mismatch"

    print("KERNEL_OK")
</pallas_src>

<mosaic_0001>
module attributes {stable_mosaic.version = 11 : i64} {
  func.func @_mlp_kernel(%arg0: i32, %arg1: memref<8x16xf32, #tpu.memory_space<vmem>>, %arg2: memref<16x32xf32, #tpu.memory_space<vmem>>, %arg3: memref<1x32xf32, #tpu.memory_space<vmem>>, %arg4: memref<32x32xf32, #tpu.memory_space<vmem>>, %arg5: memref<1x32xf32, #tpu.memory_space<vmem>>, %arg6: memref<1x32xf32, #tpu.memory_space<vmem>>, %arg7: memref<1x1xf32, #tpu.memory_space<smem>>, %arg8: memref<8x1xf32, #tpu.memory_space<vmem>>) attributes {dimension_semantics = [#tpu.dimension_semantics<parallel>], iteration_bounds = array<i64: 1>, scalar_prefetch = 0 : i64, scratch_operands = 0 : i64, tpu.core_type = #tpu.core_type<tc>, window_params = [{transform_indices = @transform_0, window_bounds = array<i64: 8, 16>}, {pipeline_mode = #tpu.pipeline_mode<synchronous>, transform_indices = @transform_1, window_bounds = array<i64: 16, 32>}, {pipeline_mode = #tpu.pipeline_mode<synchronous>, transform_indices = @transform_2, window_bounds = array<i64: 1, 32>}, {pipeline_mode = #tpu.pipeline_mode<synchronous>, transform_indices = @transform_3, window_bounds = array<i64: 32, 32>}, {pipeline_mode = #tpu.pipeline_mode<synchronous>, transform_indices = @transform_4, window_bounds = array<i64: 1, 32>}, {pipeline_mode = #tpu.pipeline_mode<synchronous>, transform_indices = @transform_5, window_bounds = array<i64: 1, 32>}, {transform_indices = @transform_6, window_bounds = array<i64: 1, 1>}, {transform_indices = @transform_7, window_bounds = array<i64: 8, 1>}]} {
    %c0 = arith.constant 0 : index
    %c0_0 = arith.constant 0 : index
    %0 = vector.load %arg1[%c0, %c0_0] : memref<8x16xf32, #tpu.memory_space<vmem>>, vector<8x16xf32>
    %c0_1 = arith.constant 0 : index
    %c0_2 = arith.constant 0 : index
    %1 = vector.load %arg2[%c0_1, %c0_2] : memref<16x32xf32, #tpu.memory_space<vmem>>, vector<16x32xf32>
    %c0_3 = arith.constant 0 : index
    %c0_4 = arith.constant 0 : index
    %2 = vector.load %arg3[%c0_3, %c0_4] : memref<1x32xf32, #tpu.memory_space<vmem>>, vector<1x32xf32>
    %cst = arith.constant dense<0.000000e+00> : vector<8x32xf32>
    %3 = tpu.matmul %0, %1, %cst {dimension_numbers = #tpu.dot_dimension_numbers<[1], [0], [0], [1], [0, 0, 1, 1], [], []>} : vector<8x16xf32>, vector<16x32xf32>, vector<8x32xf32> -> vector<8x32xf32>
    %4 = vector.broadcast %2 : vector<1x32xf32> to vector<8x32xf32>
    %5 = arith.addf %3, %4 : vector<8x32xf32>
    %cst_5 = arith.constant 0.000000e+00 : f32
    %6 = vector.broadcast %cst_5 : f32 to vector<8x32xf32>
    %7 = arith.maximumf %5, %6 : vector<8x32xf32>
    %c0_6 = arith.constant 0 : index
    %c0_7 = arith.constant 0 : index
    %8 = vector.load %arg4[%c0_6, %c0_7] : memref<32x32xf32, #tpu.memory_space<vmem>>, vector<32x32xf32>
    %c0_8 = arith.constant 0 : index
    %c0_9 = arith.constant 0 : index
    %9 = vector.load %arg5[%c0_8, %c0_9] : memref<1x32xf32, #tpu.memory_space<vmem>>, vector<1x32xf32>
    %cst_10 = arith.constant dense<0.000000e+00> : vector<8x32xf32>
    %10 = tpu.matmul %7, %8, %cst_10 {dimension_numbers = #tpu.dot_dimension_numbers<[1], [0], [0], [1], [0, 0, 1, 1], [], []>} : vector<8x32xf32>, vector<32x32xf32>, vector<8x32xf32> -> vector<8x32xf32>
    %11 = vector.broadcast %9 : vector<1x32xf32> to vector<8x32xf32>
    %12 = arith.addf %10, %11 : vector<8x32xf32>
    %cst_11 = arith.constant 0.000000e+00 : f32
    %13 = vector.broadcast %cst_11 : f32 to vector<8x32xf32>
    %14 = arith.maximumf %12, %13 : vector<8x32xf32>
    %c0_12 = arith.constant 0 : index
    %c0_13 = arith.constant 0 : index
    %15 = vector.load %arg6[%c0_12, %c0_13] : memref<1x32xf32, #tpu.memory_space<vmem>>, vector<1x32xf32>
    %c0_14 = arith.constant 0 : index
    %c0_15 = arith.constant 0 : index
    %16 = memref.load %arg7[%c0_14, %c0_15] : memref<1x1xf32, #tpu.memory_space<smem>>
    %17 = vector.broadcast %15 : vector<1x32xf32> to vector<8x32xf32>
    %18 = arith.mulf %14, %17 : vector<8x32xf32>
    %cst_16 = arith.constant dense<0.000000e+00> : vector<8xf32>
    %19 = vector.multi_reduction <add>, %18, %cst_16 [1] : vector<8x32xf32> to vector<8xf32>
    %20 = vector.shape_cast %19 : vector<8xf32> to vector<8x1xf32>
    %21 = vector.broadcast %16 : f32 to vector<8x1xf32>
    %22 = arith.addf %20, %21 : vector<8x1xf32>
    %23 = arith.negf %22 : vector<8x1xf32>
    %24 = math.exp %23 : vector<8x1xf32>
    %cst_17 = arith.constant 1.000000e+00 : f32
    %25 = vector.broadcast %cst_17 : f32 to vector<8x1xf32>
    %26 = arith.addf %25, %24 : vector<8x1xf32>
    %27 = arith.divf %25, %26 : vector<8x1xf32>
    %c0_18 = arith.constant 0 : index
    %c0_19 = arith.constant 0 : index
    %28 = vector.load %arg8[%c0_18, %c0_19] : memref<8x1xf32, #tpu.memory_space<vmem>>, vector<8x1xf32>
    tpu.vector_store %arg8[%c0_18, %c0_19], %27 {strides = array<i32>} : memref<8x1xf32, #tpu.memory_space<vmem>>, vector<8x1xf32>,
    return
  }
  func.func @transform_0(%arg0: i32) -> (i32, i32) {
    %c0_i32 = arith.constant 0 : i32
    %c0_i32_0 = arith.constant 0 : i32
    return %arg0, %c0_i32 : i32, i32
  }
  func.func @transform_1(%arg0: i32) -> (i32, i32) {
    %c0_i32 = arith.constant 0 : i32
    %c0_i32_0 = arith.constant 0 : i32
    %c0_i32_1 = arith.constant 0 : i32
    return %c0_i32, %c0_i32_0 : i32, i32
  }
  func.func @transform_2(%arg0: i32) -> (i32, i32) {
    %c0_i32 = arith.constant 0 : i32
    %c0_i32_0 = arith.constant 0 : i32
    %c0_i32_1 = arith.constant 0 : i32
    return %c0_i32, %c0_i32_0 : i32, i32
  }
  func.func @transform_3(%arg0: i32) -> (i32, i32) {
    %c0_i32 = arith.constant 0 : i32
    %c0_i32_0 = arith.constant 0 : i32
    %c0_i32_1 = arith.constant 0 : i32
    return %c0_i32, %c0_i32_0 : i32, i32
  }
  func.func @transform_4(%arg0: i32) -> (i32, i32) {
    %c0_i32 = arith.constant 0 : i32
    %c0_i32_0 = arith.constant 0 : i32
    %c0_i32_1 = arith.constant 0 : i32
    return %c0_i32, %c0_i32_0 : i32, i32
  }
  func.func @transform_5(%arg0: i32) -> (i32, i32) {
    %c0_i32 = arith.constant 0 : i32
    %c0_i32_0 = arith.constant 0 : i32
    %c0_i32_1 = arith.constant 0 : i32
    return %c0_i32, %c0_i32_0 : i32, i32
  }
  func.func @transform_6(%arg0: i32) -> (i32, i32) {
    %c0_i32 = arith.constant 0 : i32
    %c0_i32_0 = arith.constant 0 : i32
    %c0_i32_1 = arith.constant 0 : i32
    return %c0_i32, %c0_i32_0 : i32, i32
  }
  func.func @transform_7(%arg0: i32) -> (i32, i32) {
    %c0_i32 = arith.constant 0 : i32
    %c0_i32_0 = arith.constant 0 : i32
    return %arg0, %c0_i32 : i32, i32
  }
}

</mosaic_0001>

<bundles_post_ra>
// kernel: tpu_custom_call.1
= control target key start
LH: loop header
LB: loop body
LE: loop exit
PB: predicated region body
PF: predicated region fallthrough
CT: control target
= control target key end

     0   :  { %13 = vsyncpa [#allocation4], 0  ;;  %s443_s0 = inlined_call_operand.hbm [shape: f32[8,16], index: 0, kind: input, shape index: {}]   ;;  %s444_s1 = inlined_call_operand.hbm [shape: f32[16,32], index: 1, kind: input, shape index: {}]   ;;  %s445_s2 = inlined_call_operand.vmem [shape: f32[1,32], index: 2, kind: input, shape index: {}]   ;;  %s446_s3 = inlined_call_operand.hbm [shape: f32[32,32], index: 3, kind: input, shape index: {}]   ;;  %s447_s4 = inlined_call_operand.vmem [shape: f32[1,32], index: 4, kind: input, shape index: {}]   ;;  %s448_s5 = inlined_call_operand.vmem [shape: f32[1,32], index: 5, kind: input, shape index: {}]   ;;  %s449_s6 = inlined_call_operand.<no memory space> [shape: f32[1,1], index: 6, kind: input, shape index: {}]   ;;  %s450_s7 = inlined_call_operand.vmem [shape: f32[8,1], index: 7, kind: output, shape index: {}]  }
   0x1   :  { %14 = vsyncpa [#allocation6], 0  ;;  %s372_s24 = smov [#allocation5]  }
   0x2   :  { %s30_s25 = sshll.u32 %s372_s24, 4  ;;  %s31_s25 = int_to_ptr.vmem [resolvable:$true] %s30_s25 }
   0x3   :  { %s316_s26 = scalar_lea.vmem %s31_s25, 256  ;;  %p321_p1 = scmp.lt.s32.totalorder %s31_s25, %s31_s25 }
   0x4   :  { %p317_p0 = scmp.ne.s32.totalorder %s31_s25, %s316_s26  ;;  %p322_p2 = scmp.lt.s32.totalorder %s316_s26, %s316_s26 }
   0x6   :  { %p323_p3 = por %p322_p2, %p321_p1 }
   0x8   :  { %p324_p4 = pnand %p323_p3, %p317_p0 }
   0xa   :  { %327 = shalt.err (!%p324_p4)
}
   0xb   :  { %s373_s27 = smov 128   ;;  %s374_s28 = smov 8  }
   0xc   :  { %36 = dma.hbm_to_vmem [thread:$0]  %s444_s1, 256, %s31_s25, [#allocation6], %s373_s27, %s373_s27, %s374_s28  }
   0xd   :  { %s375_s8 = smov [#allocation3]   ;;  %s376_s10 = smov [#allocation7]  }
   0xe   :  { %s21_s9 = sshll.u32 %s375_s8, 4  ;;  %s44_s11 = sshll.u32 %s376_s10, 4  ;;  %s22_s9 = int_to_ptr.vmem [resolvable:$true] %s21_s9  ;;  %s45_s11 = int_to_ptr.vmem [resolvable:$true] %s44_s11 }
   0xf   :  { %s336_s12 = scalar_lea.vmem %s22_s9, 128  ;;  %p341_p6 = scmp.lt.s32.totalorder %s22_s9, %s22_s9 }
  0x10   :  { %p337_p5 = scmp.ne.s32.totalorder %s22_s9, %s336_s12  ;;  %p342_p7 = scmp.lt.s32.totalorder %s336_s12, %s336_s12 }
  0x12   :  { %p343_p8 = por %p342_p7, %p341_p6 }
  0x14   :  { %p344_p9 = pnand %p343_p8, %p337_p5 }
  0x16   :  { %347 = shalt.err (!%p344_p9)
}
  0x17   :  { %24 = dma.hbm_to_vmem [thread:$0]  %s443_s0, 128, %s22_s9, [#allocation4]  }
  0x18   :  { %s356_s15 = scalar_lea.vmem %s45_s11, 512  ;;  %p361_p11 = scmp.lt.s32.totalorder %s45_s11, %s45_s11 }
  0x19   :  { %p357_p10 = scmp.ne.s32.totalorder %s45_s11, %s356_s15  ;;  %p362_p12 = scmp.lt.s32.totalorder %s356_s15, %s356_s15 }
  0x1b   :  { %p363_p13 = por %p362_p12, %p361_p11 }
  0x1d   :  { %p364_p0 = pnand %p363_p13, %p357_p10 }
  0x1f   :  { %367 = shalt.err (!%p364_p0)
}
  0x20   :  { %50 = dma.hbm_to_vmem [thread:$0]  %s446_s3, 512, %s45_s11, [#allocation6], %s373_s27, %s373_s27, %s374_s28  }
  0x21   :  { %368 = dma.done.wait [#allocation4], 128  }
  0x22   :  { %369 = vsyncadd [#allocation4], 4294967168 }
  0x23   :  { %370 = dma.done.wait [#allocation6], 768  }
  0x24   :  { %371 = vsyncadd [#allocation6], 4294966528  ;;  %v377_v0 = vmov 0.0   ;;  %vm378_vm0 = vmmov 0   ;;  %v68_v1 = vld [vmem:[#allocation5 + $0x8] sm:$0xff]  ;;  %v67_v2 = vld [vmem:[#allocation5] sm:$0xff]  ;;  %v249_v21 = vstv %s449_s6 }
  0x25   :  { %279 = vmatprep.subr.mxu0 %v377_v0  ;;  %283 = vmatprep.mubr.msk.f32.mxu0 %vm378_vm0, %v377_v0  ;;  %v66_v3 = vld [vmem:[#allocation3] sm:$0xff]  ;;  %vm76_vm1 = vcmask 130048   ;;  %v154_v4 = vld [vmem:[#allocation7 + $0x18] sm:$0xff]  ;;  %v153_v5 = vld [vmem:[#allocation7 + $0x10] sm:$0xff]  ;;  %vm162_vm2 = vcmask 261120   ;;  %vm257_vm3 = vcmask 7168  }
  0x26   :  { %286 = vmatprep.subr.mxu1 %v377_v0  ;;  %294 = vmatprep.mubr.msk.f32.mxu1 %vm378_vm0, %v377_v0  ;;  %v152_v6 = vld [vmem:[#allocation7 + $0x8] sm:$0xff]  ;;  %v151_v7 = vld [vmem:[#allocation7] sm:$0xff] }
  0x27   :  { %280 = vmatpush3.msra.mxu0 %v68_v1  ;;  %287 = vmatpush3.msra.mxu1 %v154_v4  ;;  %v265_v8 = vld [vmem:[%s445_s2] ss:$0 sm:$0xff] }
  0x28   :  { %281 = vmatprep.subr.mxu0 %v377_v0  ;;  %288 = vmatprep.subr.mxu1 %v377_v0  ;;  %v267_v13 = vld [vmem:[%s447_s4] ss:$0 sm:$0xff] }
  0x29   :  { %282 = vmatpush3.msra.mxu0 %v67_v2  ;;  %289 = vmatpush3.msra.mxu1 %v153_v5  ;;  %v269_v17 = vld [vmem:[%s448_s5] ss:$0 sm:$0xff] }
  0x2a   :  { %284 = vmatmul.mubr.msk.f32.vlgmr.msra.gmra.mxu0 %vm76_vm1, %v66_v3  ;;  %290 = vmatprep.subr.mxu1 %v377_v0 }
  0x2b   :  { %291 = vmatpush3.msra.mxu1 %v152_v6 }
  0x2c   :  { %292 = vmatprep.subr.mxu1 %v377_v0 }
  0x2d   :  { %293 = vmatpush3.msra.mxu1 %v151_v7 }
  0xea   :  { %v146_v9 = vpop.f32.mrf.mxu0 }
  0xeb   :  { %v147_v10 = vadd.f32 %v265_v8, %v146_v9 }
  0xec   :  { %v285_v11 = vpop.f32.mrf.mxu0 }
  0xed   :  { %v150_v12 = vmax.f32 %v147_v10, 0.0 }
  0xef   :  { %295 = vmatmul.mubr.msk.f32.vlgmr.msra.gmra.mxu1 %vm162_vm2, %v150_v12 }
 0x1af   :  { %v232_v14 = vpop.f32.mrf.mxu1 }
 0x1b0   :  { %v233_v15 = vadd.f32 %v267_v13, %v232_v14 }
 0x1b1   :  { %v296_v16 = vpop.f32.mrf.mxu1 }
 0x1b2   :  { %v236_v18 = vmax.f32 %v233_v15, 0.0 }
 0x1b4   :  { %v245_v19 = vmul.f32 %v269_v17, %v236_v18 }
 0x1b6   :  { %v246_v20 = vsel %vm162_vm2, %v245_v19, 0.0 }
 0x1b7   :  { %247 = vadd.xlane.f32.xlu0 %v246_v20 }
 0x240   :  { %v248_v22 = vpop.xlane.xlu0 %247 }
 0x241   :  { %v250_v23 = vadd.f32 %v249_v21, %v248_v22 }
 0x243   :  { %v270_v24 = vmul.f32 -1.442695, %v250_v23 }
 0x245   :  { %304 = vpow2.f32 %v270_v24 }
 0x252   :  { %v305_v25 = vpop.eup %304 }
 0x253   :  { %v254_v26 = vadd.f32 1.0, %v305_v25 }
 0x255   :  { %306 = vrcp.f32 %v254_v26 }
 0x262   :  { %v307_v27 = vpop.eup %306 }
 0x263   :  { %258 = vst.msk [vmem:[%s450_s7] sm:$0xff] %vm257_vm3, %v307_v27 }
 0x264   :  { %263 = vsyncpa [#allocation4], 1 }
 0x265   :  { %264 = vsyncpa [#allocation6], 1 }

</bundles_post_ra>
